<compile_context>
chip_gen: v6e
topology: v6e:2x2x1
jax: 0.10.0
libtpu: 0.0.40
codegen_flags: <defaults>
</compile_context>

<pallas_src>
import functools

import jax
import jax.numpy as jnp
from jax import lax
from jax.experimental import pallas as pl
from jax.experimental.pallas import tpu as pltpu


# ---------------------------------------------------------------------------
# Tile-size helper: largest candidate that evenly divides `dim`, else full dim.
# Candidates respect the (8, 128) sublane/lane tiling constraints; the full-dim
# fallback is always legal (block == array extent).
# ---------------------------------------------------------------------------
def _pick_tile(dim, preferred):
    for t in preferred:
        if dim % t == 0:
            return t
    return dim  # single block along this axis


# ---------------------------------------------------------------------------
# Kernel 1: dense / linear layer   y = x @ W_t + b
#   x    : (M, K)
#   W_t  : (K, N)     (already transposed PyTorch weight)
#   b    : (1, N)
#   y    : (M, N)
# Tiled over (M, N, K); K is the reduction axis ("arbitrary", last in grid),
# partial products accumulate in a float32 VMEM scratch, bias added at flush.
# ---------------------------------------------------------------------------
def _linear_kernel(x_ref, w_ref, b_ref, o_ref, acc_ref):
    @pl.when(pl.program_id(2) == 0)
    def _init():
        acc_ref[...] = jnp.zeros_like(acc_ref)

    acc_ref[...] += jnp.dot(x_ref[...], w_ref[...],
                            preferred_element_type=jnp.float32)

    @pl.when(pl.program_id(2) == pl.num_programs(2) - 1)
    def _flush():
        o_ref[...] = (acc_ref[...] + b_ref[...].astype(jnp.float32)
                      ).astype(o_ref.dtype)


def pallas_linear(x2d, w_t, b):
    M, K = x2d.shape
    K2, N = w_t.shape
    assert K == K2
    tm = _pick_tile(M, (256, 128, 64, 32, 16, 8))   # sublane dim: mult of 8
    tn = _pick_tile(N, (256, 128))                  # lane dim: mult of 128
    tk = _pick_tile(K, (512, 256, 128))             # reduction depth
    grid = (M // tm, N // tn, K // tk)

    bytes_accessed = (M * K + K * N + M * N + N) * x2d.dtype.itemsize
    return pl.pallas_call(
        _linear_kernel,
        out_shape=jax.ShapeDtypeStruct((M, N), x2d.dtype),
        grid=grid,
        in_specs=[
            pl.BlockSpec((tm, tk), lambda i, j, k: (i, k)),
            pl.BlockSpec((tk, tn), lambda i, j, k: (k, j)),
            pl.BlockSpec((1, tn), lambda i, j, k: (0, j)),
        ],
        out_specs=pl.BlockSpec((tm, tn), lambda i, j, k: (i, j)),
        scratch_shapes=[pltpu.VMEM((tm, tn), jnp.float32)],
        compiler_params=pltpu.CompilerParams(
            dimension_semantics=("parallel", "parallel", "arbitrary")),
        cost_estimate=pl.CostEstimate(
            flops=2 * M * N * K, transcendentals=0,
            bytes_accessed=bytes_accessed),
    )(x2d, w_t, b.reshape(1, N))


# ---------------------------------------------------------------------------
# Kernel 2: scaled-dot-product attention for one batch element per grid step.
#   qkv_ref : (S, 3E) — fused QKV activation [Q | K | V], each section head-major
#             (matches PyTorch reshape(B,S,3,H,D): Q head h at cols h*D..h*D+D).
#   o_ref   : (S, E)  — output already in (B, S, E) layout (no transpose needed).
# Heads are processed with a static unrolled loop; per-head Q/K/V slabs are
# loaded straight from the VMEM Ref (static slices) to keep vreg pressure low.
# Per-head matmuls hit the MXU with f32 accumulation.
# ---------------------------------------------------------------------------
def _attn_kernel(qkv_ref, o_ref, *, num_heads, head_dim, scale):
    E = num_heads * head_dim
    outs = []
    for h in range(num_heads):                      # static unroll over heads
        base = h * head_dim
        # Per-head loads from VMEM (not from a materialized (S, 3E) value).
        # Fold softmax scale into q: S*D muls instead of S*S.
        q_h = qkv_ref[:, base:base + head_dim] * scale
        k_h = qkv_ref[:, E + base:E + base + head_dim]
        v_h = qkv_ref[:, 2 * E + base:2 * E + base + head_dim]

        # q @ k^T without materializing k.T: contract dim 1 against dim 1.
        s = lax.dot_general(q_h, k_h, (((1,), (1,)), ((), ())),
                            preferred_element_type=jnp.float32)     # (S, S)
        s = s - jnp.max(s, axis=-1, keepdims=True)
        p = jnp.exp(s)
        p = p * pl.reciprocal(jnp.sum(p, axis=-1, keepdims=True), approx=True)
        o_h = jnp.dot(p.astype(v_h.dtype), v_h,
                      preferred_element_type=jnp.float32)            # (S, D)
        outs.append(o_h)
    # Single (S, E) store per step — lane-dense when E is a multiple of 128.
    o_ref[...] = jnp.concatenate(outs, axis=-1).astype(o_ref.dtype)


def pallas_attention(qkv_3d, num_heads, head_dim, out_dtype):
    B, S, threeE = qkv_3d.shape
    E = num_heads * head_dim
    assert threeE == 3 * E
    scale = float(head_dim) ** -0.5
    kernel = functools.partial(_attn_kernel, num_heads=num_heads,
                               head_dim=head_dim, scale=scale)
    return pl.pallas_call(
        kernel,
        out_shape=jax.ShapeDtypeStruct((B, S, E), out_dtype),
        grid=(B,),
        in_specs=[pl.BlockSpec((None, S, 3 * E), lambda b: (b, 0, 0))],
        out_specs=pl.BlockSpec((None, S, E), lambda b: (b, 0, 0)),
        compiler_params=pltpu.CompilerParams(
            dimension_semantics=("parallel",)),
        cost_estimate=pl.CostEstimate(
            flops=4 * B * num_heads * S * S * head_dim,
            transcendentals=B * num_heads * S * S,
            bytes_accessed=(B * S * 4 * E) * qkv_3d.dtype.itemsize),
    )(qkv_3d)


# ---------------------------------------------------------------------------
# Full MultiHeadAttention forward (matches the PyTorch module semantics).
# Only free contiguous reshapes between kernels — no HBM transposes.
# ---------------------------------------------------------------------------
def multi_head_attention(x, params, num_heads):
    B, S, E = x.shape
    head_dim = E // num_heads

    # QKV projection: (B*S, E) @ (E, 3E) + (3E,)
    qkv = pallas_linear(x.reshape(B * S, E), params["w_qkv_t"], params["b_qkv"])
    qkv = qkv.reshape(B, S, 3 * E)                  # contiguous reshape (free)

    # Attention, reading Q/K/V straight from the fused activation; output is
    # already in (B, S, E) layout.
    o = pallas_attention(qkv, num_heads, head_dim, x.dtype)

    # Output projection
    out = pallas_linear(o.reshape(B * S, E), params["w_proj_t"], params["b_proj"])
    return out.reshape(B, S, E)


def init_params(key, embed_dim):
    # Deterministic synthetic parameters (shapes match nn.Linear in the module).
    k1, k2, k3, k4 = jax.random.split(key, 4)
    scale = embed_dim ** -0.5
    w_qkv = jax.random.normal(k1, (3 * embed_dim, embed_dim), jnp.float32) * scale
    b_qkv = jax.random.normal(k2, (3 * embed_dim,), jnp.float32) * 0.02
    w_proj = jax.random.normal(k3, (embed_dim, embed_dim), jnp.float32) * scale
    b_proj = jax.random.normal(k4, (embed_dim,), jnp.float32) * 0.02
    return {
        "w_qkv_t": w_qkv.T,    # (E, 3E)
        "b_qkv": b_qkv,        # (3E,)
        "w_proj_t": w_proj.T,  # (E, E)
        "b_proj": b_proj,      # (E,)
    }


def reference_mha(x, params, num_heads):
    """Plain-JAX reference mirroring the PyTorch forward."""
    B, S, E = x.shape
    head_dim = E // num_heads
    qkv = x @ params["w_qkv_t"] + params["b_qkv"]
    qkv = qkv.reshape(B, S, 3, num_heads, head_dim).transpose(2, 0, 3, 1, 4)
    q, k, v = qkv[0], qkv[1], qkv[2]
    attn = jax.nn.softmax(q @ k.transpose(0, 1, 3, 2) * head_dim ** -0.5, axis=-1)
    o = (attn @ v).transpose(0, 2, 1, 3).reshape(B, S, E)
    return o @ params["w_proj_t"] + params["b_proj"]


if __name__ == "__main__":
    B, S, E, H = 2, 8, 32, 4

    key = jax.random.PRNGKey(0)
    kx, kp = jax.random.split(key)
    x = jax.random.normal(kx, (B, S, E), jnp.float32)
    params = init_params(kp, E)

    mha = jax.jit(functools.partial(multi_head_attention, num_heads=H))
    out = jax.block_until_ready(mha(x, params))

    ref = reference_mha(x, params, H)
    assert out.shape == (B, S, E)
    # Tolerance relaxed vs 1e-4 because the softmax denominator uses the
    # approximate (EUP) reciprocal — expected precision change, not an error.
    assert jnp.allclose(out, ref, atol=2e-2, rtol=2e-2), "mismatch vs reference"

    print("KERNEL_OK")
</pallas_src>

<mosaic_0001>
module attributes {stable_mosaic.version = 11 : i64} {
  func.func @_linear_kernel(%arg0: i32, %arg1: i32, %arg2: i32, %arg3: memref<16x32xf32, #tpu.memory_space<vmem>>, %arg4: memref<32x96xf32, #tpu.memory_space<vmem>>, %arg5: memref<1x96xf32, #tpu.memory_space<vmem>>, %arg6: memref<16x96xf32, #tpu.memory_space<vmem>>, %arg7: memref<16x96xf32, #tpu.memory_space<vmem>>) attributes {dimension_semantics = [#tpu.dimension_semantics<parallel>, #tpu.dimension_semantics<parallel>, #tpu.dimension_semantics<arbitrary>], iteration_bounds = array<i64: 1, 1, 1>, scalar_prefetch = 0 : i64, scratch_operands = 1 : i64, tpu.core_type = #tpu.core_type<tc>, window_params = [{transform_indices = @transform_0, window_bounds = array<i64: 16, 32>}, {transform_indices = @transform_1, window_bounds = array<i64: 32, 96>}, {transform_indices = @transform_2, window_bounds = array<i64: 1, 96>}, {transform_indices = @transform_3, window_bounds = array<i64: 16, 96>}]} {
    %c0_i32 = arith.constant 0 : i32
    %0 = arith.cmpi eq, %arg2, %c0_i32 : i32
    %1 = arith.extui %0 : i1 to i32
    %c0_i32_0 = arith.constant 0 : i32
    %2 = arith.cmpi ne, %1, %c0_i32_0 : i32
    scf.if %2 {
      %cst_10 = arith.constant 0.000000e+00 : f32
      %12 = vector.broadcast %cst_10 : f32 to vector<16x96xf32>
      %c0_11 = arith.constant 0 : index
      %c0_12 = arith.constant 0 : index
      %13 = vector.load %arg7[%c0_11, %c0_12] : memref<16x96xf32, #tpu.memory_space<vmem>>, vector<16x96xf32>
      tpu.vector_store %arg7[%c0_11, %c0_12], %12 {strides = array<i32>} : memref<16x96xf32, #tpu.memory_space<vmem>>, vector<16x96xf32>,
    } else {
    }
    %c0 = arith.constant 0 : index
    %c0_1 = arith.constant 0 : index
    %3 = vector.load %arg7[%c0, %c0_1] : memref<16x96xf32, #tpu.memory_space<vmem>>, vector<16x96xf32>
    %c0_2 = arith.constant 0 : index
    %c0_3 = arith.constant 0 : index
    %4 = vector.load %arg3[%c0_2, %c0_3] : memref<16x32xf32, #tpu.memory_space<vmem>>, vector<16x32xf32>
    %c0_4 = arith.constant 0 : index
    %c0_5 = arith.constant 0 : index
    %5 = vector.load %arg4[%c0_4, %c0_5] : memref<32x96xf32, #tpu.memory_space<vmem>>, vector<32x96xf32>
    %cst = arith.constant dense<0.000000e+00> : vector<16x96xf32>
    %6 = tpu.matmul %4, %5, %cst {dimension_numbers = #tpu.dot_dimension_numbers<[1], [0], [0], [1], [0, 0, 1, 1], [], []>} : vector<16x32xf32>, vector<32x96xf32>, vector<16x96xf32> -> vector<16x96xf32>
    %7 = arith.addf %3, %6 : vector<16x96xf32>
    %c0_6 = arith.constant 0 : index
    %c0_7 = arith.constant 0 : index
    %8 = vector.load %arg7[%c0_6, %c0_7] : memref<16x96xf32, #tpu.memory_space<vmem>>, vector<16x96xf32>
    tpu.vector_store %arg7[%c0_6, %c0_7], %7 {strides = array<i32>} : memref<16x96xf32, #tpu.memory_space<vmem>>, vector<16x96xf32>,
    %c0_i32_8 = arith.constant 0 : i32
    %9 = arith.cmpi eq, %arg2, %c0_i32_8 : i32
    %10 = arith.extui %9 : i1 to i32
    %c0_i32_9 = arith.constant 0 : i32
    %11 = arith.cmpi ne, %10, %c0_i32_9 : i32
    scf.if %11 {
      %c0_10 = arith.constant 0 : index
      %c0_11 = arith.constant 0 : index
      %12 = vector.load %arg7[%c0_10, %c0_11] : memref<16x96xf32, #tpu.memory_space<vmem>>, vector<16x96xf32>
      %c0_12 = arith.constant 0 : index
      %c0_13 = arith.constant 0 : index
      %13 = vector.load %arg5[%c0_12, %c0_13] : memref<1x96xf32, #tpu.memory_space<vmem>>, vector<1x96xf32>
      %14 = vector.broadcast %13 : vector<1x96xf32> to vector<16x96xf32>
      %15 = arith.addf %12, %14 : vector<16x96xf32>
      %c0_14 = arith.constant 0 : index
      %c0_15 = arith.constant 0 : index
      %16 = vector.load %arg6[%c0_14, %c0_15] : memref<16x96xf32, #tpu.memory_space<vmem>>, vector<16x96xf32>
      tpu.vector_store %arg6[%c0_14, %c0_15], %15 {strides = array<i32>} : memref<16x96xf32, #tpu.memory_space<vmem>>, vector<16x96xf32>,
    } else {
    }
    return
  }
  func.func @transform_0(%arg0: i32, %arg1: i32, %arg2: i32) -> (i32, i32) {
    %c0_i32 = arith.constant 0 : i32
    return %arg0, %arg2 : i32, i32
  }
  func.func @transform_1(%arg0: i32, %arg1: i32, %arg2: i32) -> (i32, i32) {
    %c0_i32 = arith.constant 0 : i32
    return %arg2, %arg1 : i32, i32
  }
  func.func @transform_2(%arg0: i32, %arg1: i32, %arg2: i32) -> (i32, i32) {
    %c0_i32 = arith.constant 0 : i32
    %c0_i32_0 = arith.constant 0 : i32
    return %c0_i32, %arg1 : i32, i32
  }
  func.func @transform_3(%arg0: i32, %arg1: i32, %arg2: i32) -> (i32, i32) {
    %c0_i32 = arith.constant 0 : i32
    return %arg0, %arg1 : i32, i32
  }
}

module attributes {stable_mosaic.version = 11 : i64} {
  func.func @_linear_kernel(%arg0: i32, %arg1: i32, %arg2: i32, %arg3: memref<16x32xf32, #tpu.memory_space<vmem>>, %arg4: memref<32x32xf32, #tpu.memory_space<vmem>>, %arg5: memref<1x32xf32, #tpu.memory_space<vmem>>, %arg6: memref<16x32xf32, #tpu.memory_space<vmem>>, %arg7: memref<16x32xf32, #tpu.memory_space<vmem>>) attributes {dimension_semantics = [#tpu.dimension_semantics<parallel>, #tpu.dimension_semantics<parallel>, #tpu.dimension_semantics<arbitrary>], iteration_bounds = array<i64: 1, 1, 1>, scalar_prefetch = 0 : i64, scratch_operands = 1 : i64, tpu.core_type = #tpu.core_type<tc>, window_params = [{transform_indices = @transform_0, window_bounds = array<i64: 16, 32>}, {transform_indices = @transform_1, window_bounds = array<i64: 32, 32>}, {transform_indices = @transform_2, window_bounds = array<i64: 1, 32>}, {transform_indices = @transform_3, window_bounds = array<i64: 16, 32>}]} {
    %c0_i32 = arith.constant 0 : i32
    %0 = arith.cmpi eq, %arg2, %c0_i32 : i32
    %1 = arith.extui %0 : i1 to i32
    %c0_i32_0 = arith.constant 0 : i32
    %2 = arith.cmpi ne, %1, %c0_i32_0 : i32
    scf.if %2 {
      %cst_10 = arith.constant 0.000000e+00 : f32
      %12 = vector.broadcast %cst_10 : f32 to vector<16x32xf32>
      %c0_11 = arith.constant 0 : index
      %c0_12 = arith.constant 0 : index
      %13 = vector.load %arg7[%c0_11, %c0_12] : memref<16x32xf32, #tpu.memory_space<vmem>>, vector<16x32xf32>
      tpu.vector_store %arg7[%c0_11, %c0_12], %12 {strides = array<i32>} : memref<16x32xf32, #tpu.memory_space<vmem>>, vector<16x32xf32>,
    } else {
    }
    %c0 = arith.constant 0 : index
    %c0_1 = arith.constant 0 : index
    %3 = vector.load %arg7[%c0, %c0_1] : memref<16x32xf32, #tpu.memory_space<vmem>>, vector<16x32xf32>
    %c0_2 = arith.constant 0 : index
    %c0_3 = arith.constant 0 : index
    %4 = vector.load %arg3[%c0_2, %c0_3] : memref<16x32xf32, #tpu.memory_space<vmem>>, vector<16x32xf32>
    %c0_4 = arith.constant 0 : index
    %c0_5 = arith.constant 0 : index
    %5 = vector.load %arg4[%c0_4, %c0_5] : memref<32x32xf32, #tpu.memory_space<vmem>>, vector<32x32xf32>
    %cst = arith.constant dense<0.000000e+00> : vector<16x32xf32>
    %6 = tpu.matmul %4, %5, %cst {dimension_numbers = #tpu.dot_dimension_numbers<[1], [0], [0], [1], [0, 0, 1, 1], [], []>} : vector<16x32xf32>, vector<32x32xf32>, vector<16x32xf32> -> vector<16x32xf32>
    %7 = arith.addf %3, %6 : vector<16x32xf32>
    %c0_6 = arith.constant 0 : index
    %c0_7 = arith.constant 0 : index
    %8 = vector.load %arg7[%c0_6, %c0_7] : memref<16x32xf32, #tpu.memory_space<vmem>>, vector<16x32xf32>
    tpu.vector_store %arg7[%c0_6, %c0_7], %7 {strides = array<i32>} : memref<16x32xf32, #tpu.memory_space<vmem>>, vector<16x32xf32>,
    %c0_i32_8 = arith.constant 0 : i32
    %9 = arith.cmpi eq, %arg2, %c0_i32_8 : i32
    %10 = arith.extui %9 : i1 to i32
    %c0_i32_9 = arith.constant 0 : i32
    %11 = arith.cmpi ne, %10, %c0_i32_9 : i32
    scf.if %11 {
      %c0_10 = arith.constant 0 : index
      %c0_11 = arith.constant 0 : index
      %12 = vector.load %arg7[%c0_10, %c0_11] : memref<16x32xf32, #tpu.memory_space<vmem>>, vector<16x32xf32>
      %c0_12 = arith.constant 0 : index
      %c0_13 = arith.constant 0 : index
      %13 = vector.load %arg5[%c0_12, %c0_13] : memref<1x32xf32, #tpu.memory_space<vmem>>, vector<1x32xf32>
      %14 = vector.broadcast %13 : vector<1x32xf32> to vector<16x32xf32>
      %15 = arith.addf %12, %14 : vector<16x32xf32>
      %c0_14 = arith.constant 0 : index
      %c0_15 = arith.constant 0 : index
      %16 = vector.load %arg6[%c0_14, %c0_15] : memref<16x32xf32, #tpu.memory_space<vmem>>, vector<16x32xf32>
      tpu.vector_store %arg6[%c0_14, %c0_15], %15 {strides = array<i32>} : memref<16x32xf32, #tpu.memory_space<vmem>>, vector<16x32xf32>,
    } else {
    }
    return
  }
  func.func @transform_0(%arg0: i32, %arg1: i32, %arg2: i32) -> (i32, i32) {
    %c0_i32 = arith.constant 0 : i32
    return %arg0, %arg2 : i32, i32
  }
  func.func @transform_1(%arg0: i32, %arg1: i32, %arg2: i32) -> (i32, i32) {
    %c0_i32 = arith.constant 0 : i32
    return %arg2, %arg1 : i32, i32
  }
  func.func @transform_2(%arg0: i32, %arg1: i32, %arg2: i32) -> (i32, i32) {
    %c0_i32 = arith.constant 0 : i32
    %c0_i32_0 = arith.constant 0 : i32
    return %c0_i32, %arg1 : i32, i32
  }
  func.func @transform_3(%arg0: i32, %arg1: i32, %arg2: i32) -> (i32, i32) {
    %c0_i32 = arith.constant 0 : i32
    return %arg0, %arg1 : i32, i32
  }
}

module attributes {stable_mosaic.version = 11 : i64} {
  func.func @_attn_kernel(%arg0: i32, %arg1: memref<1x8x96xf32, #tpu.memory_space<vmem>>, %arg2: memref<1x8x32xf32, #tpu.memory_space<vmem>>) attributes {dimension_semantics = [#tpu.dimension_semantics<parallel>], iteration_bounds = array<i64: 2>, scalar_prefetch = 0 : i64, scratch_operands = 0 : i64, tpu.core_type = #tpu.core_type<tc>, window_params = [{transform_indices = @transform_0, window_bounds = array<i64: 1, 8, 96>}, {transform_indices = @transform_1, window_bounds = array<i64: 1, 8, 32>}]} {
    %c0 = arith.constant 0 : index
    %c0_0 = arith.constant 0 : index
    %c0_1 = arith.constant 0 : index
    %0 = vector.load %arg1[%c0, %c0_0, %c0_1] : memref<1x8x96xf32, #tpu.memory_space<vmem>>, vector<1x8x8xf32>
    %1 = vector.shape_cast %0 : vector<1x8x8xf32> to vector<8x8xf32>
    %cst = arith.constant 0.353553385 : f32
    %2 = vector.broadcast %cst : f32 to vector<8x8xf32>
    %3 = arith.mulf %1, %2 : vector<8x8xf32>
    %c0_2 = arith.constant 0 : index
    %c0_3 = arith.constant 0 : index
    %c32 = arith.constant 32 : index
    %4 = vector.load %arg1[%c0_2, %c0_3, %c32] : memref<1x8x96xf32, #tpu.memory_space<vmem>>, vector<1x8x8xf32>
    %5 = vector.shape_cast %4 : vector<1x8x8xf32> to vector<8x8xf32>
    %c0_4 = arith.constant 0 : index
    %c0_5 = arith.constant 0 : index
    %c64 = arith.constant 64 : index
    %6 = vector.load %arg1[%c0_4, %c0_5, %c64] : memref<1x8x96xf32, #tpu.memory_space<vmem>>, vector<1x8x8xf32>
    %7 = vector.shape_cast %6 : vector<1x8x8xf32> to vector<8x8xf32>
    %cst_6 = arith.constant dense<0.000000e+00> : vector<8x8xf32>
    %8 = tpu.matmul %3, %5, %cst_6 {dimension_numbers = #tpu.dot_dimension_numbers<[1], [1], [0], [0], [0, 0, 1, 0], [], []>} : vector<8x8xf32>, vector<8x8xf32>, vector<8x8xf32> -> vector<8x8xf32>
    %cst_7 = arith.constant dense<0xFF800000> : vector<8xf32>
    %9 = vector.multi_reduction <maximumf>, %8, %cst_7 [1] : vector<8x8xf32> to vector<8xf32>
    %10 = vector.shape_cast %9 : vector<8xf32> to vector<8x1xf32>
    %11 = vector.broadcast %10 : vector<8x1xf32> to vector<8x8xf32>
    %12 = arith.subf %8, %11 : vector<8x8xf32>
    %13 = math.exp %12 : vector<8x8xf32>
    %cst_8 = arith.constant dense<0.000000e+00> : vector<8xf32>
    %14 = vector.multi_reduction <add>, %13, %cst_8 [1] : vector<8x8xf32> to vector<8xf32>
    %15 = vector.shape_cast %14 : vector<8xf32> to vector<8x1xf32>
    %16 = tpu.reciprocal %15 {approx = true} : vector<8x1xf32> -> vector<8x1xf32>
    %17 = vector.broadcast %16 : vector<8x1xf32> to vector<8x8xf32>
    %18 = arith.mulf %13, %17 : vector<8x8xf32>
    %cst_9 = arith.constant dense<0.000000e+00> : vector<8x8xf32>
    %19 = tpu.matmul %18, %7, %cst_9 {dimension_numbers = #tpu.dot_dimension_numbers<[1], [0], [0], [1], [0, 0, 1, 1], [], []>} : vector<8x8xf32>, vector<8x8xf32>, vector<8x8xf32> -> vector<8x8xf32>
    %c0_10 = arith.constant 0 : index
    %c0_11 = arith.constant 0 : index
    %c8 = arith.constant 8 : index
    %20 = vector.load %arg1[%c0_10, %c0_11, %c8] : memref<1x8x96xf32, #tpu.memory_space<vmem>>, vector<1x8x8xf32>
    %21 = vector.shape_cast %20 : vector<1x8x8xf32> to vector<8x8xf32>
    %cst_12 = arith.constant 0.353553385 : f32
    %22 = vector.broadcast %cst_12 : f32 to vector<8x8xf32>
    %23 = arith.mulf %21, %22 : vector<8x8xf32>
    %c0_13 = arith.constant 0 : index
    %c0_14 = arith.constant 0 : index
    %c40 = arith.constant 40 : index
    %24 = vector.load %arg1[%c0_13, %c0_14, %c40] : memref<1x8x96xf32, #tpu.memory_space<vmem>>, vector<1x8x8xf32>
    %25 = vector.shape_cast %24 : vector<1x8x8xf32> to vector<8x8xf32>
    %c0_15 = arith.constant 0 : index
    %c0_16 = arith.constant 0 : index
    %c72 = arith.constant 72 : index
    %26 = vector.load %arg1[%c0_15, %c0_16, %c72] : memref<1x8x96xf32, #tpu.memory_space<vmem>>, vector<1x8x8xf32>
    %27 = vector.shape_cast %26 : vector<1x8x8xf32> to vector<8x8xf32>
    %cst_17 = arith.constant dense<0.000000e+00> : vector<8x8xf32>
    %28 = tpu.matmul %23, %25, %cst_17 {dimension_numbers = #tpu.dot_dimension_numbers<[1], [1], [0], [0], [0, 0, 1, 0], [], []>} : vector<8x8xf32>, vector<8x8xf32>, vector<8x8xf32> -> vector<8x8xf32>
    %cst_18 = arith.constant dense<0xFF800000> : vector<8xf32>
    %29 = vector.multi_reduction <maximumf>, %28, %cst_18 [1] : vector<8x8xf32> to vector<8xf32>
    %30 = vector.shape_cast %29 : vector<8xf32> to vector<8x1xf32>
    %31 = vector.broadcast %30 : vector<8x1xf32> to vector<8x8xf32>
    %32 = arith.subf %28, %31 : vector<8x8xf32>
    %33 = math.exp %32 : vector<8x8xf32>
    %cst_19 = arith.constant dense<0.000000e+00> : vector<8xf32>
    %34 = vector.multi_reduction <add>, %33, %cst_19 [1] : vector<8x8xf32> to vector<8xf32>
    %35 = vector.shape_cast %34 : vector<8xf32> to vector<8x1xf32>
    %36 = tpu.reciprocal %35 {approx = true} : vector<8x1xf32> -> vector<8x1xf32>
    %37 = vector.broadcast %36 : vector<8x1xf32> to vector<8x8xf32>
    %38 = arith.mulf %33, %37 : vector<8x8xf32>
    %cst_20 = arith.constant dense<0.000000e+00> : vector<8x8xf32>
    %39 = tpu.matmul %38, %27, %cst_20 {dimension_numbers = #tpu.dot_dimension_numbers<[1], [0], [0], [1], [0, 0, 1, 1], [], []>} : vector<8x8xf32>, vector<8x8xf32>, vector<8x8xf32> -> vector<8x8xf32>
    %c0_21 = arith.constant 0 : index
    %c0_22 = arith.constant 0 : index
    %c16 = arith.constant 16 : index
    %40 = vector.load %arg1[%c0_21, %c0_22, %c16] : memref<1x8x96xf32, #tpu.memory_space<vmem>>, vector<1x8x8xf32>
    %41 = vector.shape_cast %40 : vector<1x8x8xf32> to vector<8x8xf32>
    %cst_23 = arith.constant 0.353553385 : f32
    %42 = vector.broadcast %cst_23 : f32 to vector<8x8xf32>
    %43 = arith.mulf %41, %42 : vector<8x8xf32>
    %c0_24 = arith.constant 0 : index
    %c0_25 = arith.constant 0 : index
    %c48 = arith.constant 48 : index
    %44 = vector.load %arg1[%c0_24, %c0_25, %c48] : memref<1x8x96xf32, #tpu.memory_space<vmem>>, vector<1x8x8xf32>
    %45 = vector.shape_cast %44 : vector<1x8x8xf32> to vector<8x8xf32>
    %c0_26 = arith.constant 0 : index
    %c0_27 = arith.constant 0 : index
    %c80 = arith.constant 80 : index
    %46 = vector.load %arg1[%c0_26, %c0_27, %c80] : memref<1x8x96xf32, #tpu.memory_space<vmem>>, vector<1x8x8xf32>
    %47 = vector.shape_cast %46 : vector<1x8x8xf32> to vector<8x8xf32>
    %cst_28 = arith.constant dense<0.000000e+00> : vector<8x8xf32>
    %48 = tpu.matmul %43, %45, %cst_28 {dimension_numbers = #tpu.dot_dimension_numbers<[1], [1], [0], [0], [0, 0, 1, 0], [], []>} : vector<8x8xf32>, vector<8x8xf32>, vector<8x8xf32> -> vector<8x8xf32>
    %cst_29 = arith.constant dense<0xFF800000> : vector<8xf32>
    %49 = vector.multi_reduction <maximumf>, %48, %cst_29 [1] : vector<8x8xf32> to vector<8xf32>
    %50 = vector.shape_cast %49 : vector<8xf32> to vector<8x1xf32>
    %51 = vector.broadcast %50 : vector<8x1xf32> to vector<8x8xf32>
    %52 = arith.subf %48, %51 : vector<8x8xf32>
    %53 = math.exp %52 : vector<8x8xf32>
    %cst_30 = arith.constant dense<0.000000e+00> : vector<8xf32>
    %54 = vector.multi_reduction <add>, %53, %cst_30 [1] : vector<8x8xf32> to vector<8xf32>
    %55 = vector.shape_cast %54 : vector<8xf32> to vector<8x1xf32>
    %56 = tpu.reciprocal %55 {approx = true} : vector<8x1xf32> -> vector<8x1xf32>
    %57 = vector.broadcast %56 : vector<8x1xf32> to vector<8x8xf32>
    %58 = arith.mulf %53, %57 : vector<8x8xf32>
    %cst_31 = arith.constant dense<0.000000e+00> : vector<8x8xf32>
    %59 = tpu.matmul %58, %47, %cst_31 {dimension_numbers = #tpu.dot_dimension_numbers<[1], [0], [0], [1], [0, 0, 1, 1], [], []>} : vector<8x8xf32>, vector<8x8xf32>, vector<8x8xf32> -> vector<8x8xf32>
    %c0_32 = arith.constant 0 : index
    %c0_33 = arith.constant 0 : index
    %c24 = arith.constant 24 : index
    %60 = vector.load %arg1[%c0_32, %c0_33, %c24] : memref<1x8x96xf32, #tpu.memory_space<vmem>>, vector<1x8x8xf32>
    %61 = vector.shape_cast %60 : vector<1x8x8xf32> to vector<8x8xf32>
    %cst_34 = arith.constant 0.353553385 : f32
    %62 = vector.broadcast %cst_34 : f32 to vector<8x8xf32>
    %63 = arith.mulf %61, %62 : vector<8x8xf32>
    %c0_35 = arith.constant 0 : index
    %c0_36 = arith.constant 0 : index
    %c56 = arith.constant 56 : index
    %64 = vector.load %arg1[%c0_35, %c0_36, %c56] : memref<1x8x96xf32, #tpu.memory_space<vmem>>, vector<1x8x8xf32>
    %65 = vector.shape_cast %64 : vector<1x8x8xf32> to vector<8x8xf32>
    %c0_37 = arith.constant 0 : index
    %c0_38 = arith.constant 0 : index
    %c88 = arith.constant 88 : index
    %66 = vector.load %arg1[%c0_37, %c0_38, %c88] : memref<1x8x96xf32, #tpu.memory_space<vmem>>, vector<1x8x8xf32>
    %67 = vector.shape_cast %66 : vector<1x8x8xf32> to vector<8x8xf32>
    %cst_39 = arith.constant dense<0.000000e+00> : vector<8x8xf32>
    %68 = tpu.matmul %63, %65, %cst_39 {dimension_numbers = #tpu.dot_dimension_numbers<[1], [1], [0], [0], [0, 0, 1, 0], [], []>} : vector<8x8xf32>, vector<8x8xf32>, vector<8x8xf32> -> vector<8x8xf32>
    %cst_40 = arith.constant dense<0xFF800000> : vector<8xf32>
    %69 = vector.multi_reduction <maximumf>, %68, %cst_40 [1] : vector<8x8xf32> to vector<8xf32>
    %70 = vector.shape_cast %69 : vector<8xf32> to vector<8x1xf32>
    %71 = vector.broadcast %70 : vector<8x1xf32> to vector<8x8xf32>
    %72 = arith.subf %68, %71 : vector<8x8xf32>
    %73 = math.exp %72 : vector<8x8xf32>
    %cst_41 = arith.constant dense<0.000000e+00> : vector<8xf32>
    %74 = vector.multi_reduction <add>, %73, %cst_41 [1] : vector<8x8xf32> to vector<8xf32>
    %75 = vector.shape_cast %74 : vector<8xf32> to vector<8x1xf32>
    %76 = tpu.reciprocal %75 {approx = true} : vector<8x1xf32> -> vector<8x1xf32>
    %77 = vector.broadcast %76 : vector<8x1xf32> to vector<8x8xf32>
    %78 = arith.mulf %73, %77 : vector<8x8xf32>
    %cst_42 = arith.constant dense<0.000000e+00> : vector<8x8xf32>
    %79 = tpu.matmul %78, %67, %cst_42 {dimension_numbers = #tpu.dot_dimension_numbers<[1], [0], [0], [1], [0, 0, 1, 1], [], []>} : vector<8x8xf32>, vector<8x8xf32>, vector<8x8xf32> -> vector<8x8xf32>
    %80 = tpu.concatenate %19, %39, %59, %79 in 1 : vector<8x8xf32>, vector<8x8xf32>, vector<8x8xf32>, vector<8x8xf32> -> vector<8x32xf32>
    %c0_43 = arith.constant 0 : index
    %c0_44 = arith.constant 0 : index
    %c0_45 = arith.constant 0 : index
    %81 = vector.load %arg2[%c0_43, %c0_44, %c0_45] : memref<1x8x32xf32, #tpu.memory_space<vmem>>, vector<1x8x32xf32>
    %82 = vector.shape_cast %81 : vector<1x8x32xf32> to vector<8x32xf32>
    %83 = vector.shape_cast %80 : vector<8x32xf32> to vector<1x8x32xf32>
    tpu.vector_store %arg2[%c0_43, %c0_44, %c0_45], %83 {strides = array<i32>} : memref<1x8x32xf32, #tpu.memory_space<vmem>>, vector<1x8x32xf32>,
    return
  }
  func.func @transform_0(%arg0: i32) -> (i32, i32, i32) {
    %c0_i32 = arith.constant 0 : i32
    %c0_i32_0 = arith.constant 0 : i32
    %c0_i32_1 = arith.constant 0 : i32
    return %arg0, %c0_i32, %c0_i32_0 : i32, i32, i32
  }
  func.func @transform_1(%arg0: i32) -> (i32, i32, i32) {
    %c0_i32 = arith.constant 0 : i32
    %c0_i32_0 = arith.constant 0 : i32
    %c0_i32_1 = arith.constant 0 : i32
    return %arg0, %c0_i32, %c0_i32_0 : i32, i32, i32
  }
}

</mosaic_0001>

<bundles_post_ra>
// kernel: multi_head_attention.3
= control target key start
LH: loop header
LB: loop body
LE: loop exit
PB: predicated region body
PF: predicated region fallthrough
CT: control target
= control target key end

     0   :  { %8 = vsyncpa [#allocation4], 0  ;;  %s283_s0 = inlined_call_operand.hbm [shape: f32[16,32], index: 0, kind: input, shape index: {}]   ;;  %s284_s1 = inlined_call_operand.hbm [shape: f32[32,96], index: 1, kind: input, shape index: {}]   ;;  %s285_s2 = inlined_call_operand.vmem [shape: f32[1,96], index: 2, kind: input, shape index: {}]   ;;  %s286_s3 = inlined_call_operand.vmem [shape: f32[16,96], index: 3, kind: output, shape index: {}]  }
   0x1   :  { %9 = vsyncpa [#allocation6], 0  ;;  %s235_s12 = smov [#allocation3]  }
   0x2   :  { %s15_s13 = sshll.u32 %s235_s12, 4  ;;  %s16_s13 = int_to_ptr.vmem [resolvable:$true] %s15_s13 }
   0x3   :  { %s199_s14 = scalar_lea.vmem %s16_s13, 256  ;;  %p204_p1 = scmp.lt.s32.totalorder %s16_s13, %s16_s13 }
   0x4   :  { %p200_p0 = scmp.ne.s32.totalorder %s16_s13, %s199_s14  ;;  %p205_p2 = scmp.lt.s32.totalorder %s199_s14, %s199_s14 }
   0x6   :  { %p206_p3 = por %p205_p2, %p204_p1 }
   0x8   :  { %p207_p4 = pnand %p206_p3, %p200_p0 }
   0xa   :  { %210 = shalt.err (!%p207_p4)
}
   0xb   :  { %s236_s15 = smov 128   ;;  %s237_s16 = smov 8  }
   0xc   :  { %21 = dma.hbm_to_vmem [thread:$0]  %s283_s0, 256, %s16_s13, [#allocation4], %s236_s15, %s236_s15, %s237_s16  }
   0xd   :  { %s238_s19 = smov [#allocation5]  }
   0xe   :  { %s27_s20 = sshll.u32 %s238_s19, 4  ;;  %s28_s20 = int_to_ptr.vmem [resolvable:$true] %s27_s20 }
   0xf   :  { %s219_s21 = scalar_lea.vmem %s28_s20, 512  ;;  %p224_p6 = scmp.lt.s32.totalorder %s28_s20, %s28_s20 }
  0x10   :  { %p220_p5 = scmp.ne.s32.totalorder %s28_s20, %s219_s21  ;;  %p225_p7 = scmp.lt.s32.totalorder %s219_s21, %s219_s21 }
  0x12   :  { %p226_p8 = por %p225_p7, %p224_p6 }
  0x14   :  { %p227_p9 = pnand %p226_p8, %p220_p5 }
  0x16   :  { %230 = shalt.err (!%p227_p9)
}
  0x17   :  { %33 = dma.hbm_to_vmem [thread:$0]  %s284_s1, 512, %s28_s20, [#allocation6], %s236_s15, %s236_s15, %s237_s16  }
  0x18   :  { %231 = dma.done.wait [#allocation4], 256  }
  0x19   :  { %232 = vsyncadd [#allocation4], 4294967040 }
  0x1a   :  { %233 = dma.done.wait [#allocation6], 512  }
  0x1b   :  { %234 = vsyncadd [#allocation6], 4294966784  ;;  %vm46_vm0 = vcmask 785408   ;;  %v239_v0 = vmov 0.0   ;;  %vm57_vm1 = vcmask 261120   ;;  %v56_v1 = vld [vmem:[#allocation5 + $0x18] sm:$0xff] }
  0x1c   :  { %48 = vst.msk [vmem:[#allocation2 + $0x8] sm:$0xff] %vm46_vm0, %v239_v0  ;;  %47 = vst.msk [vmem:[#allocation2] sm:$0xff] %vm46_vm0, %v239_v0  ;;  %v55_v2 = vld [vmem:[#allocation5 + $0x10] sm:$0xff]  ;;  %175 = vmatprep.subr.mxu0 %v56_v1  ;;  %v54_v4 = vld [vmem:[#allocation5 + $0x8] sm:$0xff] }
  0x1d   :  { %v51_v3 = vld [vmem:[#allocation3] sm:$0xff]  ;;  %176 = vmatpush3.msra.mxu0 %v56_v1  ;;  %v53_v5 = vld [vmem:[#allocation5] sm:$0xff]  ;;  %v52_v6 = vld [vmem:[#allocation3 + $0x8] sm:$0xff] }
  0x1e   :  { %183 = vmatprep.mubr.msk.f32.mxu0 %vm57_vm1, %v51_v3  ;;  %177 = vmatprep.subr.mxu0 %v55_v2  ;;  %v168_v13 = vld [vmem:[%s285_s2] ss:$0 sm:$0xff] }
  0x1f   :  { %178 = vmatpush3.msra.mxu0 %v55_v2 }
  0x20   :  { %179 = vmatprep.subr.mxu0 %v54_v4 }
  0x21   :  { %180 = vmatpush3.msra.mxu0 %v54_v4 }
  0x22   :  { %181 = vmatprep.subr.mxu0 %v53_v5 }
  0x23   :  { %182 = vmatpush3.msra.mxu0 %v53_v5  ;;  %v50_v7 = vld [vmem:[#allocation2 + $0x8] sm:$0xff]  ;;  %v49_v9 = vld [vmem:[#allocation2] sm:$0xff] }
  0x24   :  { %184 = vmatmul.mubr.msk.f32.vlgmr.msra.gmra.mxu0 %vm57_vm1, %v52_v6 }
  0xe4   :  { %v185_v8 = vpop.f32.mrf.mxu0 }
  0xe5   :  { %v140_v10 = vadd.f32 %v185_v8, %v50_v7 }
  0xe6   :  { %v130_v11 = vpop.f32.mrf.mxu0 }
  0xe7   :  { %143 = vst.msk [vmem:[#allocation2 + $0x8] sm:$0xff] %vm46_vm0, %v140_v10  ;;  %v139_v12 = vadd.f32 %v130_v11, %v49_v9 }
  0xe9   :  { %142 = vst.msk [vmem:[#allocation2] sm:$0xff] %vm46_vm0, %v139_v12 }
  0xee   :  { %v148_v14 = vld [vmem:[#allocation2 + $0x8] sm:$0xff] }
  0xef   :  { %v157_v15 = vadd.f32 %v168_v13, %v148_v14 }
  0xf0   :  { %v147_v16 = vld [vmem:[#allocation2] sm:$0xff] }
  0xf1   :  { %159 = vst.msk [vmem:[%s286_s3 + $0x8] sm:$0xff] %vm46_vm0, %v157_v15  ;;  %v156_v17 = vadd.f32 %v168_v13, %v147_v16 }
  0xf3   :  { %158 = vst.msk [vmem:[%s286_s3] sm:$0xff] %vm46_vm0, %v156_v17 }
  0xf4   :  { %164 = vsyncpa [#allocation4], 1 }
  0xf5   :  { %165 = vsyncpa [#allocation6], 1 }

// kernel: multi_head_attention.5
= control target key start
LH: loop header
LB: loop body
LE: loop exit
PB: predicated region body
PF: predicated region fallthrough
CT: control target
= control target key end

     0   :  { %vm19_vm0 = vcmask 261120   ;;  %v194_v3 = vmov 0.0   ;;  %s250_s0 = inlined_call_operand.vmem [shape: f32[16,32], index: 0, kind: input, shape index: {}]   ;;  %s251_s1 = inlined_call_operand.vmem [shape: f32[32,32], index: 1, kind: input, shape index: {}]   ;;  %s252_s2 = inlined_call_operand.vmem [shape: f32[1,32], index: 2, kind: input, shape index: {}]   ;;  %s253_s3 = inlined_call_operand.hbm [shape: f32[16,32], index: 3, kind: output, shape index: {}]  }
   0x1   :  { %v29_v0 = vld [vmem:[%s251_s1 + $0x18] sm:$0xff]  ;;  %v28_v1 = vld [vmem:[%s251_s1 + $0x10] sm:$0xff]  ;;  %v24_v2 = vld [vmem:[%s250_s0] sm:$0xff]  ;;  %21 = vst.msk [vmem:[#allocation2 + $0x8] sm:$0xff] %vm19_vm0, %v194_v3 }
   0x2   :  { %157 = vmatprep.subr.mxu0 %v29_v0  ;;  %20 = vst.msk [vmem:[#allocation2] sm:$0xff] %vm19_vm0, %v194_v3  ;;  %v27_v4 = vld [vmem:[%s251_s1 + $0x8] sm:$0xff]  ;;  %165 = vmatprep.mubr.msk.f32.mxu0 %vm19_vm0, %v24_v2 }
   0x3   :  { %158 = vmatpush3.msra.mxu0 %v29_v0 }
   0x4   :  { %8 = vsyncpa [#allocation4], 0  ;;  %159 = vmatprep.subr.mxu0 %v28_v1  ;;  %v26_v5 = vld [vmem:[%s251_s1] sm:$0xff]  ;;  %v25_v6 = vld [vmem:[%s250_s0 + $0x8] sm:$0xff]  ;;  %s195_s25 = smov [#allocation3]  }
   0x5   :  { %160 = vmatpush3.msra.mxu0 %v28_v1  ;;  %v150_v13 = vld [vmem:[%s252_s2] ss:$0 sm:$0xff]  ;;  %s137_s0 = sshll.u32 %s195_s25, 4  ;;  %s138_s0 = int_to_ptr.vmem [resolvable:$true] %s137_s0 }
   0x6   :  { %161 = vmatprep.subr.mxu0 %v27_v4  ;;  %s172_s26 = scalar_lea.vmem %s138_s0, 256  ;;  %p177_p1 = scmp.lt.s32.totalorder %s138_s0, %s138_s0 }
   0x7   :  { %162 = vmatpush3.msra.mxu0 %v27_v4  ;;  %p173_p0 = scmp.ne.s32.totalorder %s138_s0, %s172_s26  ;;  %p178_p2 = scmp.lt.s32.totalorder %s172_s26, %s172_s26 }
   0x8   :  { %163 = vmatprep.subr.mxu0 %v26_v5  ;;  %v23_v7 = vld [vmem:[#allocation2 + $0x8] sm:$0xff] }
   0x9   :  { %164 = vmatpush3.msra.mxu0 %v26_v5  ;;  %v22_v9 = vld [vmem:[#allocation2] sm:$0xff]  ;;  %p179_p3 = por %p178_p2, %p177_p1 }
   0xa   :  { %166 = vmatmul.mubr.msk.f32.vlgmr.msra.gmra.mxu0 %vm19_vm0, %v25_v6 }
   0xb   :  { %p180_p4 = pnand %p179_p3, %p173_p0 }
  0xca   :  { %v167_v8 = vpop.f32.mrf.mxu0 }
  0xcb   :  { %v113_v10 = vadd.f32 %v167_v8, %v23_v7 }
  0xcc   :  { %v103_v11 = vpop.f32.mrf.mxu0 }
  0xcd   :  { %115 = vst.msk [vmem:[#allocation2 + $0x8] sm:$0xff] %vm19_vm0, %v113_v10  ;;  %v112_v12 = vadd.f32 %v103_v11, %v22_v9 }
  0xcf   :  { %114 = vst.msk [vmem:[#allocation2] sm:$0xff] %vm19_vm0, %v112_v12 }
  0xd4   :  { %v120_v14 = vld [vmem:[#allocation2 + $0x8] sm:$0xff] }
  0xd5   :  { %v129_v15 = vadd.f32 %v150_v13, %v120_v14 }
  0xd6   :  { %v119_v16 = vld [vmem:[#allocation2] sm:$0xff] }
  0xd7   :  { %v128_v17 = vadd.f32 %v150_v13, %v119_v16  ;;  %131 = vst.msk [vmem:[#allocation3 + $0x8] sm:$0xff] %vm19_vm0, %v129_v15 }
  0xd9   :  { %130 = vst.msk [vmem:[#allocation3] sm:$0xff] %vm19_vm0, %v128_v17 }
  0xda   :  { %183 = shalt.err (!%p180_p4)
}
  0xdb   :  { %s196_s27 = smov 128   ;;  %s197_s2 = smov 8  }
  0xdc   :  { %143 = dma.vmem_to_hbm [thread:$0]  %s138_s0, 256, %s253_s3, [#allocation4], %s196_s27, %s196_s27, %s197_s2  }
  0xdd   :  { %192 = dma.done.wait [#allocation4], 256  }
  0xde   :  { %193 = vsyncadd [#allocation4], 4294967040 }
  0xdf   :  { %147 = vsyncpa [#allocation4], 1 }

// kernel: multi_head_attention.4
= control target key start
LH: loop header
LB: loop body
LE: loop exit
PB: predicated region body
PF: predicated region fallthrough
CT: control target
= control target key end

     0   :  { %s998_s6 = smov 0   ;;  %s1081_s0 = inlined_call_operand.vmem [shape: f32[2,8,96], index: 0, kind: input, shape index: {}]   ;;  %s1082_s1 = inlined_call_operand.vmem [shape: f32[2,8,32], index: 1, kind: output, shape index: {}]  }
   0x1 LB: > { %s847_s7 = sadd.s32 4294967295, %s970_s6   ;;  %p851_p0 = scmp.ge.s32.totalorder %s970_s6, 1  ;;  %s970_s6 = sphi %s998_s6, %s11_s6  }
   0x2   : > { %p86_p1 = scmp.lt.s32.totalorder %s970_s6, 3 }
   0x4   : > { %p87_p2 = pnand %p851_p0, %p86_p1 }
   0x5   : > { %p104_p3 = scmp.lt.s32.totalorder (!%p87_p2), %s847_s7, 1  ;;  %s974_s12 = smov (!%p87_p2), 96  }
   0x6   : > { %90 = sbr.rel (%p87_p2) target bundleno = 1465 (0x5b9), region = 24  ;;  %s975_s13 = smov (!%p87_p2), 64  }
   0x7   : > { %s976_s14 = smov (!%p87_p2), 88   ;;  %s977_s15 = smov (!%p87_p2), 120  }
   0x8   : > { %s978_s16 = smov (!%p87_p2), 80   ;;  %s979_s17 = smov (!%p87_p2), 72  }
   0x9   : > { %s980_s18 = smov (!%p87_p2), 112   ;;  %s981_s19 = smov (!%p87_p2), 104  }
   0xa   : > { %s982_s20 = smov (!%p87_p2), 56   ;;  %s983_s21 = smov (!%p87_p2), 40  }
   0xb   : > { %v972_v0 = vmov 0.0   ;;  %vm973_vm0 = vmmov 0   ;;  %s1084_s7 = smov (!%p104_p3, %s847_s7), 1  ;;  %vm117_vm1 = vcmask 64512   ;;  %s984_s22 = smov 48   ;;  %vm788_vm2 = vcmask 130048  }
   0xc   : > { %884 = vmatprep.subr.mxu0 %v972_v0  ;;  %886 = vmatprep.mubr.msk.f32.mxu0 %vm973_vm0, %v972_v0  ;;  %s852_s8 = sshll.u32 %s1084_s7, 3  ;;  %s985_s23 = smov 8   ;;  %vm790_vm3 = vcmask 195584   ;;  %vm792_vm4 = vcmask 261120  }
   0xd   : > { %889 = vmatprep.subr.mxu1 %v972_v0  ;;  %891 = vmatprep.mubr.msk.f32.mxu1 %vm973_vm0, %v972_v0  ;;  %s107_s11 = scalar_lea.vmem %s1081_s0, %s852_s8  ;;  %s986_s24 = smov 16  }
   0xe   : > { %v1020_v1 = vld [vmem:[%s107_s11] sm:$0xff]  ;;  %s987_s25 = smov 24   ;;  %s111_s28 = scalar_lea.vmem %s1082_s1, %s852_s8 }
   0xf   : > { %115 = vrot.lane.b32.xlu0 %v1020_v1, %s974_s12  ;;  %v113_v3 = vmul.f32 0.35355338, %v1020_v1  ;;  %204 = vrot.lane.b32.xlu1 %v1020_v1, %s975_s13 }
  0x13   : > { %282 = vrot.lane.b32.xlu1 %v1020_v1, %s976_s14 }
  0x17   : > { %280 = vrot.lane.b32.xlu1 %v113_v3, %s977_s15 }
  0x1b   : > { %447 = vrot.lane.b32.xlu1 %v1020_v1, %s978_s16 }
  0x81   : > { %v116_v2 = vpop.permute.xlu0 %115  ;;  %v205_v7 = vpop.permute.xlu1 %204 }
  0x82   : > { %885 = vmatpush3.xpose.msk.msra.mxu0 %vm117_vm1, %v116_v2  ;;  %890 = vmatpush3.msra.mxu1 %v205_v7 }
  0x83   : > { %899 = vmatprep.subr.mxu0 %v972_v0  ;;  %894 = vmatprep.subr.mxu1 %v972_v0 }
  0x85   : > { %887 = vmatmul.mubr.msk.f32.vlgmr.msra.gmra.mxu0 %vm117_vm1, %v113_v3  ;;  %v283_v13 = vpop.permute.xlu1 %282 }
  0x86   : > { %901 = vmatprep.mubr.msk.f32.mxu0 %vm973_vm0, %v972_v0 }
  0x89   : > { %v281_v14 = vpop.permute.xlu1 %280 }
  0x8d   : > { %v448_v15 = vpop.permute.xlu1 %447 }
 0x145   : > { %v189_v4 = vpop.f32.mrf.mxu0 }
 0x146   : > { %v193_v5 = vsel %vm117_vm1, %v189_v4, -inf }
 0x147   : > { %194 = vmax.xlane.f32.xlu0 %v193_v5  ;;  %v888_v6 = vpop.f32.mrf.mxu0 }
 0x15d   : > { %612 = vrot.lane.b32.xlu0 %v1020_v1, %s979_s17 }
 0x1d0   : > { %v195_v8 = vpop.xlane.xlu0 %194 }
 0x1d1   : > { %v196_v9 = vsub.f32 %v189_v4, %v195_v8 }
 0x1d3   : > { %v197_v10 = vmul.f32 1.442695, %v196_v9 }
 0x1d4   : > { %v613_v20 = vpop.permute.xlu0 %612 }
 0x1d5   : > { %948 = vpow2.f32 %v197_v10 }
 0x1e2   : > { %v949_v11 = vpop.eup %948 }
 0x1e3   : > { %v199_v12 = vsel %vm117_vm1, %v949_v11, 0.0 }
 0x1e4   : > { %200 = vadd.xlane.f32.xlu1 %v199_v12 }
 0x1f5   : > { %445 = vrot.lane.b32.xlu1 %v113_v3, %s980_s18 }
 0x1f9   : > { %610 = vrot.lane.b32.xlu1 %v113_v3, %s981_s19 }
 0x26d   : > { %v201_v16 = vpop.xlane.xlu1 %200 }
 0x26e   : > { %950 = vrcp.f32 %v201_v16 }
 0x271   : > { %v446_v19 = vpop.permute.xlu1 %445 }
 0x275   : > { %v611_v21 = vpop.permute.xlu1 %610 }
 0x27b   : > { %v951_v17 = vpop.eup %950 }
 0x27c   : > { %v203_v18 = vmul.f32 %v951_v17, %v949_v11 }
 0x27e   : > { %892 = vmatmul.mubr.msk.f32.vlgmr.msra.gmra.mxu1 %vm117_vm1, %v203_v18 }
 0x27f   : > { %895 = vmatpush3.xpose.msk.msra.mxu1 %vm117_vm1, %v283_v13  ;;  %896 = vmatprep.mubr.msk.f32.mxu1 %vm973_vm0, %v972_v0 }
 0x280   : > { %904 = vmatprep.subr.mxu1 %v972_v0 }
 0x282   : > { %897 = vmatmul.mubr.msk.f32.vlgmr.msra.gmra.mxu1 %vm117_vm1, %v281_v14 }
 0x283   : > { %905 = vmatpush3.xpose.msk.msra.mxu1 %vm117_vm1, %v448_v15  ;;  %906 = vmatprep.mubr.msk.f32.mxu1 %vm973_vm0, %v972_v0 }
 0x284   : > { %914 = vmatprep.subr.mxu1 %v972_v0 }
 0x286   : > { %907 = vmatmul.mubr.msk.f32.vlgmr.msra.gmra.mxu1 %vm117_vm1, %v446_v19 }
 0x287   : > { %915 = vmatpush3.xpose.msk.msra.mxu1 %vm117_vm1, %v613_v20  ;;  %916 = vmatprep.mubr.msk.f32.mxu1 %vm973_vm0, %v972_v0 }
 0x28a   : > { %917 = vmatmul.mubr.msk.f32.vlgmr.msra.gmra.mxu1 %vm117_vm1, %v611_v21 }
 0x33e   : > { %v1051_v22 = vpop.f32.mrf.mxu1 }
 0x340   : > { %v893_v23 = vpop.f32.mrf.mxu1 }
 0x342   : > { %v354_v24 = vpop.f32.mrf.mxu1 }
 0x343   : > { %v358_v25 = vsel %vm117_vm1, %v354_v24, -inf }
 0x344   : > { %359 = vmax.xlane.f32.xlu1 %v358_v25  ;;  %v898_v26 = vpop.f32.mrf.mxu1 }
 0x346   : > { %v519_v27 = vpop.f32.mrf.mxu1 }
 0x347   : > { %v523_v28 = vsel %vm117_vm1, %v519_v27, -inf }
 0x348   : > { %524 = vmax.xlane.f32.xlu0 %v523_v28  ;;  %v908_v29 = vpop.f32.mrf.mxu1 }
 0x34a   : > { %v684_v30 = vpop.f32.mrf.mxu1 }
 0x34b   : > { %v688_v31 = vsel %vm117_vm1, %v684_v30, -inf }
 0x34c   : > { %689 = vmax.xlane.f32.xlu1 %v688_v31  ;;  %v918_v32 = vpop.f32.mrf.mxu1 }
 0x35d   : > { %369 = vrot.lane.b32.xlu1 %v1020_v1, %s982_s20 }
 0x3cd   : > { %v360_v33 = vpop.xlane.xlu1 %359 }
 0x3ce   : > { %v361_v34 = vsub.f32 %v354_v24, %v360_v33 }
 0x3d0   : > { %v362_v35 = vmul.f32 1.442695, %v361_v34 }
 0x3d1   : > { %v525_v36 = vpop.xlane.xlu0 %524 }
 0x3d2   : > { %952 = vpow2.f32 %v362_v35  ;;  %v526_v37 = vsub.f32 %v519_v27, %v525_v36 }
 0x3d4   : > { %v527_v38 = vmul.f32 1.442695, %v526_v37 }
 0x3d5   : > { %v690_v39 = vpop.xlane.xlu1 %689 }
 0x3d6   : > { %954 = vpow2.f32 %v527_v38  ;;  %v691_v40 = vsub.f32 %v684_v30, %v690_v39 }
 0x3d8   : > { %v692_v41 = vmul.f32 1.442695, %v691_v40 }
 0x3d9   : > { %v370_v42 = vpop.permute.xlu1 %369 }
 0x3da   : > { %956 = vpow2.f32 %v692_v41  ;;  %900 = vmatpush3.msra.mxu0 %v370_v42 }
 0x3db   : > { %909 = vmatprep.subr.mxu0 %v972_v0 }
 0x3df   : > { %v953_v43 = vpop.eup %952 }
 0x3e0   : > { %v364_v44 = vsel %vm117_vm1, %v953_v43, 0.0 }
 0x3e1   : > { %365 = vadd.xlane.f32.xlu1 %v364_v44 }
 0x3e3   : > { %v955_v45 = vpop.eup %954 }
 0x3e4   : > { %v529_v46 = vsel %vm117_vm1, %v955_v45, 0.0 }
 0x3e5   : > { %530 = vadd.xlane.f32.xlu1 %v529_v46 }
 0x3e7   : > { %v957_v47 = vpop.eup %956 }
 0x3e8   : > { %v694_v48 = vsel %vm117_vm1, %v957_v47, 0.0 }
 0x3e9   : > { %695 = vadd.xlane.f32.xlu0 %v694_v48 }
 0x3f6   : > { %699 = vrot.lane.b32.xlu1 %v1020_v1, %s983_s21 }
 0x3ff   : > { %534 = vrot.lane.b32.xlu0 %v1020_v1, %s984_s22 }
 0x46a   : > { %v366_v49 = vpop.xlane.xlu1 %365 }
 0x46b   : > { %958 = vrcp.f32 %v366_v49 }
 0x46e   : > { %v531_v50 = vpop.xlane.xlu1 %530 }
 0x46f   : > { %960 = vrcp.f32 %v531_v50 }
 0x472   : > { %v696_v51 = vpop.xlane.xlu0 %695  ;;  %v700_v56 = vpop.permute.xlu1 %699 }
 0x473   : > { %962 = vrcp.f32 %v696_v51 }
 0x476   : > { %v535_v53 = vpop.permute.xlu0 %534 }
 0x478   : > { %v959_v52 = vpop.eup %958 }
 0x479   : > { %v368_v54 = vmul.f32 %v959_v52, %v953_v43 }
 0x47b   : > { %902 = vmatmul.mubr.msk.f32.vlgmr.msra.gmra.mxu0 %vm117_vm1, %v368_v54 }
 0x47c   : > { %v961_v55 = vpop.eup %960  ;;  %910 = vmatpush3.msra.mxu0 %v535_v53  ;;  %911 = vmatprep.mubr.msk.f32.mxu0 %vm973_vm0, %v972_v0 }
 0x47d   : > { %919 = vmatprep.subr.mxu0 %v972_v0  ;;  %v533_v57 = vmul.f32 %v961_v55, %v955_v45 }
 0x47f   : > { %912 = vmatmul.mubr.msk.f32.vlgmr.msra.gmra.mxu0 %vm117_vm1, %v533_v57 }
 0x480   : > { %v963_v58 = vpop.eup %962  ;;  %920 = vmatpush3.msra.mxu0 %v700_v56  ;;  %921 = vmatprep.mubr.msk.f32.mxu0 %vm973_vm0, %v972_v0 }
 0x481   : > { %v698_v59 = vmul.f32 %v963_v58, %v957_v47 }
 0x483   : > { %922 = vmatmul.mubr.msk.f32.vlgmr.msra.gmra.mxu0 %vm117_vm1, %v698_v59 }
 0x53b   : > { %v441_v60 = vpop.f32.mrf.mxu0 }
 0x53c   : > { %776 = vrot.lane.b32.xlu1 %v441_v60, %s985_s23 }
 0x53d   : > { %v903_v61 = vpop.f32.mrf.mxu0 }
 0x53f   : > { %v606_v62 = vpop.f32.mrf.mxu0 }
 0x540   : > { %780 = vrot.lane.b32.xlu0 %v606_v62, %s986_s24 }
 0x541   : > { %v913_v63 = vpop.f32.mrf.mxu0 }
 0x543   : > { %v771_v1 = vpop.f32.mrf.mxu0 }
 0x544   : > { %784 = vrot.lane.b32.xlu1 %v771_v1, %s987_s25 }
 0x545   : > { %v923_v2 = vpop.f32.mrf.mxu0 }
 0x5ae   : > { %v777_v3 = vpop.permute.xlu1 %776 }
 0x5af   : > { %v787_v0 = vsel %vm117_vm1, %v1051_v22, %v777_v3 }
 0x5b2   : > { %v781_v4 = vpop.permute.xlu0 %780 }
 0x5b3   : > { %v789_v5 = vsel %vm788_vm2, %v787_v0, %v781_v4 }
 0x5b6   : > { %v785_v6 = vpop.permute.xlu1 %784 }
 0x5b7   : > { %v791_v7 = vsel %vm790_vm3, %v789_v5, %v785_v6 }
 0x5b8   : > { %793 = vst.msk [vmem:[%s111_s28] sm:$0xff] %vm792_vm4, %v791_v7 }
 0x5b9 PF: > { %s11_s6 = sadd.s32 1, %s970_s6  }
 0x5ba   : > { %p8_p4 = scmp.ge.s32.totalorder %s11_s6, 4  }
 0x5bc   :  { %10 = sbr.rel (!%p8_p4) target bundleno = 1 (0x1), region = 54 }

</bundles_post_ra>
